<compile_context>
chip_gen: v7x
topology: tpu7x:2x2x1
jax: 0.10.0
libtpu: 0.0.40
codegen_flags: <defaults>
</compile_context>

<pallas_src>
import functools

import jax
import jax.numpy as jnp
from jax.experimental import pallas as pl
from jax.experimental.pallas import tpu as pltpu


def _grid_attn_kernel(g_ref, g2_ref, w_im_ref, b_im_ref, w_i_ref, b_i_ref, o_ref):
    # g_ref, g2_ref, o_ref: (C, TS)   channels on sublanes, spatial on lanes
    # w_im_ref, w_i_ref:    (C, C)    1x1x1 conv weights
    # b_im_ref, b_i_ref:    (C, 1)    biases
    x = g2_ref[...]
    # Two small MXU passes (f32 accumulation); no mid-tile sublane split.
    y_im = jnp.dot(w_im_ref[...], x, preferred_element_type=jnp.float32)
    y_im = y_im + b_im_ref[...].astype(jnp.float32)
    y_i = jnp.dot(w_i_ref[...], x, preferred_element_type=jnp.float32)
    y_i = y_i + b_i_ref[...].astype(jnp.float32)

    gate = jax.nn.sigmoid(y_im)                           # m = sigmoid(w_im(g2))
    o = g_ref[...].astype(jnp.float32) + gate * y_i       # g + m * w_i(g2)
    o_ref[...] = o.astype(o_ref.dtype)


def _round_up(x, m):
    return (x + m - 1) // m * m


@functools.lru_cache(maxsize=1)
def _vmem_budget_and_limit():
    """Generation-aware VMEM sizing: block budget ~ cap/3, limit ~ cap/2.

    v7x  (64 MiB/TC): ~21 MiB budget / 32 MiB limit.
    v5e/v6e (128 MiB): ~42 MiB budget / 64 MiB limit.
    """
    try:
        cap = int(pltpu.get_tpu_info().vmem_capacity_bytes)
    except Exception:  # pragma: no cover - conservative fallback
        cap = 128 * 1024 * 1024
    cap = max(cap, 32 * 1024 * 1024)
    return cap // 3, cap // 2


# Per-grid-step HBM traffic floor so the ~0.35 us/step overhead is amortized.
_MIN_BYTES_PER_STEP = 4 * 1024 * 1024


def _pick_spatial_tile(S, C, itemsize, N, vmem_budget):
    """Spatial tile: as large as VMEM allows, >= ~4 MiB of traffic per step,
    but still split enough that both v7x TensorCores see >= 2 steps when the
    traffic floor permits."""
    Cp = _round_up(max(C, 1), 8)  # physical sublane footprint of a (C, ts) block
    # 6 resident blocks: double-buffered g, g2, out (weights/bias are tiny).
    cap = vmem_budget // (6 * Cp * itemsize)
    cap = max(128, cap // 128 * 128)

    # Traffic floor: 3 logical blocks (g in, g2 in, o out) of C x ts x itemsize.
    floor = _round_up(max(1, _MIN_BYTES_PER_STEP // (3 * C * itemsize)), 128)

    # Megacore: aim for >= max(2, ceil(4/N)) spatial splits (>= ~4 grid steps).
    splits = max(2, -(-4 // max(N, 1)))
    ts_split = _round_up(-(-S // splits), 128)

    ts = max(floor, ts_split)   # traffic floor wins over extra splitting
    ts = min(ts, cap)           # VMEM is a hard cap
    if ts >= S:
        return S                # full spatial extent as one block
    return ts                   # multiple of 128; ragged tail handled by Pallas


def grid_attention_cs(g3, g23, w_im, b_im, w_i, b_i, *, ts=None):
    """g3, g23: (N, C, S) channels-first; w_*: (C, C); b_*: (C, 1)."""
    N, C, S = g3.shape
    vmem_budget, vmem_limit = _vmem_budget_and_limit()
    if ts is None:
        ts = _pick_spatial_tile(S, C, jnp.dtype(g3.dtype).itemsize, N, vmem_budget)
    grid = (N, pl.cdiv(S, ts))

    return pl.pallas_call(
        _grid_attn_kernel,
        out_shape=jax.ShapeDtypeStruct((N, C, S), g3.dtype),
        grid_spec=pltpu.PrefetchScalarGridSpec(
            num_scalar_prefetch=0,
            grid=grid,
            in_specs=[
                pl.BlockSpec((None, C, ts), lambda n, s: (n, 0, s)),   # g
                pl.BlockSpec((None, C, ts), lambda n, s: (n, 0, s)),   # g2
                pl.BlockSpec((C, C), lambda n, s: (0, 0)),             # W_im
                pl.BlockSpec((C, 1), lambda n, s: (0, 0)),             # b_im
                pl.BlockSpec((C, C), lambda n, s: (0, 0)),             # W_i
                pl.BlockSpec((C, 1), lambda n, s: (0, 0)),             # b_i
            ],
            out_specs=pl.BlockSpec((None, C, ts), lambda n, s: (n, 0, s)),
        ),
        compiler_params=pltpu.CompilerParams(
            dimension_semantics=("parallel", "parallel"),
            vmem_limit_bytes=vmem_limit,
        ),
    )(g3, g23, w_im, b_im, w_i, b_i)


def grid_attention_block_forward(x, g, g2, params):
    """Forward pass of _GridAttentionBlockND (dimension=3).

    x, g, g2: NCDHW float arrays (x is unused, matching the PyTorch module).
    params: dict with 'w_im' (C,C,1,1,1), 'b_im' (C,), 'w_i' (C,C,1,1,1), 'b_i' (C,)
    Returns o in NCDHW.
    """
    del x  # unused in the reference forward
    N, C, D, H, W = g2.shape
    S = D * H * W
    # NCDHW is already channels-first: flattening spatial dims is a free reshape.
    g3 = g.reshape(N, C, S)
    g23 = g2.reshape(N, C, S)
    w_im = params["w_im"].reshape(C, C)
    w_i = params["w_i"].reshape(C, C)
    b_im = params["b_im"].reshape(C, 1)
    b_i = params["b_i"].reshape(C, 1)
    o3 = grid_attention_cs(g3, g23, w_im, b_im, w_i, b_i)
    return o3.reshape(N, C, D, H, W)


def _reference_forward(g, g2, params):
    """Pure-JAX reference matching the PyTorch semantics."""
    C = g2.shape[1]
    w_im = params["w_im"].reshape(C, C)
    w_i = params["w_i"].reshape(C, C)
    conv_im = jnp.einsum("oc,ncdhw->nodhw", w_im, g2) + params["b_im"][None, :, None, None, None]
    conv_i = jnp.einsum("oc,ncdhw->nodhw", w_i, g2) + params["b_i"][None, :, None, None, None]
    m = jax.nn.sigmoid(conv_im)
    return g + m * conv_i


def init_params(key, in_channels):
    """Deterministic kaiming-style init for the two 1x1x1 convs."""
    k1, k2, k3, k4 = jax.random.split(key, 4)
    fan_in = in_channels  # kernel_size = 1
    std = (2.0 / fan_in) ** 0.5
    return {
        "w_im": std * jax.random.normal(k1, (in_channels, in_channels, 1, 1, 1), jnp.float32),
        "b_im": 0.1 * jax.random.normal(k2, (in_channels,), jnp.float32),
        "w_i": std * jax.random.normal(k3, (in_channels, in_channels, 1, 1, 1), jnp.float32),
        "b_i": 0.1 * jax.random.normal(k4, (in_channels,), jnp.float32),
    }


if __name__ == "__main__":
    key = jax.random.PRNGKey(0)
    in_channels = 4
    N, D, H, W = 2, 8, 8, 8  # small 3D volume (dimension=3)

    kx, kg, kg2, kp = jax.random.split(key, 4)
    x = jax.random.normal(kx, (N, in_channels, D, H, W), jnp.float32)   # unused by forward
    g = jax.random.normal(kg, (N, in_channels, D, H, W), jnp.float32)
    g2 = jax.random.normal(kg2, (N, in_channels, D, H, W), jnp.float32)
    params = init_params(kp, in_channels)

    out = jax.jit(grid_attention_block_forward)(x, g, g2, params)
    out = jax.block_until_ready(out)

    ref = _reference_forward(g, g2, params)
    assert out.shape == (N, in_channels, D, H, W)
    assert jnp.allclose(out, ref, atol=1e-5, rtol=1e-5), "mismatch vs reference"

    print("KERNEL_OK")
</pallas_src>

<mosaic_0001>
module attributes {stable_mosaic.version = 11 : i64} {
  func.func @_grid_attn_kernel(%arg0: i32, %arg1: i32, %arg2: memref<1x4x512xf32, #tpu.memory_space<vmem>>, %arg3: memref<1x4x512xf32, #tpu.memory_space<vmem>>, %arg4: memref<4x4xf32, #tpu.memory_space<vmem>>, %arg5: memref<4x1xf32, #tpu.memory_space<vmem>>, %arg6: memref<4x4xf32, #tpu.memory_space<vmem>>, %arg7: memref<4x1xf32, #tpu.memory_space<vmem>>, %arg8: memref<1x4x512xf32, #tpu.memory_space<vmem>>) attributes {dimension_semantics = [#tpu.dimension_semantics<parallel>, #tpu.dimension_semantics<parallel>], iteration_bounds = array<i64: 2, 1>, scalar_prefetch = 0 : i64, scratch_operands = 0 : i64, tpu.core_type = #tpu.core_type<tc>, window_params = [{transform_indices = @transform_0, window_bounds = array<i64: 1, 4, 512>}, {transform_indices = @transform_1, window_bounds = array<i64: 1, 4, 512>}, {pipeline_mode = #tpu.pipeline_mode<synchronous>, transform_indices = @transform_2, window_bounds = array<i64: 4, 4>}, {pipeline_mode = #tpu.pipeline_mode<synchronous>, transform_indices = @transform_3, window_bounds = array<i64: 4, 1>}, {pipeline_mode = #tpu.pipeline_mode<synchronous>, transform_indices = @transform_4, window_bounds = array<i64: 4, 4>}, {pipeline_mode = #tpu.pipeline_mode<synchronous>, transform_indices = @transform_5, window_bounds = array<i64: 4, 1>}, {transform_indices = @transform_6, window_bounds = array<i64: 1, 4, 512>}]} {
    %c0 = arith.constant 0 : index
    %c0_0 = arith.constant 0 : index
    %c0_1 = arith.constant 0 : index
    %0 = vector.load %arg3[%c0, %c0_0, %c0_1] : memref<1x4x512xf32, #tpu.memory_space<vmem>>, vector<1x4x512xf32>
    %1 = vector.shape_cast %0 : vector<1x4x512xf32> to vector<4x512xf32>
    %c0_2 = arith.constant 0 : index
    %c0_3 = arith.constant 0 : index
    %2 = vector.load %arg4[%c0_2, %c0_3] : memref<4x4xf32, #tpu.memory_space<vmem>>, vector<4x4xf32>
    %cst = arith.constant dense<0.000000e+00> : vector<4x512xf32>
    %3 = tpu.matmul %2, %1, %cst {dimension_numbers = #tpu.dot_dimension_numbers<[1], [0], [0], [1], [0, 0, 1, 1], [], []>} : vector<4x4xf32>, vector<4x512xf32>, vector<4x512xf32> -> vector<4x512xf32>
    %c0_4 = arith.constant 0 : index
    %c0_5 = arith.constant 0 : index
    %4 = vector.load %arg5[%c0_4, %c0_5] : memref<4x1xf32, #tpu.memory_space<vmem>>, vector<4x1xf32>
    %5 = vector.broadcast %4 : vector<4x1xf32> to vector<4x512xf32>
    %6 = arith.addf %3, %5 : vector<4x512xf32>
    %c0_6 = arith.constant 0 : index
    %c0_7 = arith.constant 0 : index
    %7 = vector.load %arg6[%c0_6, %c0_7] : memref<4x4xf32, #tpu.memory_space<vmem>>, vector<4x4xf32>
    %cst_8 = arith.constant dense<0.000000e+00> : vector<4x512xf32>
    %8 = tpu.matmul %7, %1, %cst_8 {dimension_numbers = #tpu.dot_dimension_numbers<[1], [0], [0], [1], [0, 0, 1, 1], [], []>} : vector<4x4xf32>, vector<4x512xf32>, vector<4x512xf32> -> vector<4x512xf32>
    %c0_9 = arith.constant 0 : index
    %c0_10 = arith.constant 0 : index
    %9 = vector.load %arg7[%c0_9, %c0_10] : memref<4x1xf32, #tpu.memory_space<vmem>>, vector<4x1xf32>
    %10 = vector.broadcast %9 : vector<4x1xf32> to vector<4x512xf32>
    %11 = arith.addf %8, %10 : vector<4x512xf32>
    %12 = arith.negf %6 : vector<4x512xf32>
    %13 = math.exp %12 : vector<4x512xf32>
    %cst_11 = arith.constant 1.000000e+00 : f32
    %14 = vector.broadcast %cst_11 : f32 to vector<4x512xf32>
    %15 = arith.addf %14, %13 : vector<4x512xf32>
    %16 = arith.divf %14, %15 : vector<4x512xf32>
    %c0_12 = arith.constant 0 : index
    %c0_13 = arith.constant 0 : index
    %c0_14 = arith.constant 0 : index
    %17 = vector.load %arg2[%c0_12, %c0_13, %c0_14] : memref<1x4x512xf32, #tpu.memory_space<vmem>>, vector<1x4x512xf32>
    %18 = vector.shape_cast %17 : vector<1x4x512xf32> to vector<4x512xf32>
    %19 = arith.mulf %16, %11 : vector<4x512xf32>
    %20 = arith.addf %18, %19 : vector<4x512xf32>
    %c0_15 = arith.constant 0 : index
    %c0_16 = arith.constant 0 : index
    %c0_17 = arith.constant 0 : index
    %21 = vector.load %arg8[%c0_15, %c0_16, %c0_17] : memref<1x4x512xf32, #tpu.memory_space<vmem>>, vector<1x4x512xf32>
    %22 = vector.shape_cast %21 : vector<1x4x512xf32> to vector<4x512xf32>
    %23 = vector.shape_cast %20 : vector<4x512xf32> to vector<1x4x512xf32>
    tpu.vector_store %arg8[%c0_15, %c0_16, %c0_17], %23 {strides = array<i32>} : memref<1x4x512xf32, #tpu.memory_space<vmem>>, vector<1x4x512xf32>,
    return
  }
  func.func @transform_0(%arg0: i32, %arg1: i32) -> (i32, i32, i32) {
    %c0_i32 = arith.constant 0 : i32
    %c0_i32_0 = arith.constant 0 : i32
    return %arg0, %c0_i32, %arg1 : i32, i32, i32
  }
  func.func @transform_1(%arg0: i32, %arg1: i32) -> (i32, i32, i32) {
    %c0_i32 = arith.constant 0 : i32
    %c0_i32_0 = arith.constant 0 : i32
    return %arg0, %c0_i32, %arg1 : i32, i32, i32
  }
  func.func @transform_2(%arg0: i32, %arg1: i32) -> (i32, i32) {
    %c0_i32 = arith.constant 0 : i32
    %c0_i32_0 = arith.constant 0 : i32
    %c0_i32_1 = arith.constant 0 : i32
    return %c0_i32, %c0_i32_0 : i32, i32
  }
  func.func @transform_3(%arg0: i32, %arg1: i32) -> (i32, i32) {
    %c0_i32 = arith.constant 0 : i32
    %c0_i32_0 = arith.constant 0 : i32
    %c0_i32_1 = arith.constant 0 : i32
    return %c0_i32, %c0_i32_0 : i32, i32
  }
  func.func @transform_4(%arg0: i32, %arg1: i32) -> (i32, i32) {
    %c0_i32 = arith.constant 0 : i32
    %c0_i32_0 = arith.constant 0 : i32
    %c0_i32_1 = arith.constant 0 : i32
    return %c0_i32, %c0_i32_0 : i32, i32
  }
  func.func @transform_5(%arg0: i32, %arg1: i32) -> (i32, i32) {
    %c0_i32 = arith.constant 0 : i32
    %c0_i32_0 = arith.constant 0 : i32
    %c0_i32_1 = arith.constant 0 : i32
    return %c0_i32, %c0_i32_0 : i32, i32
  }
  func.func @transform_6(%arg0: i32, %arg1: i32) -> (i32, i32, i32) {
    %c0_i32 = arith.constant 0 : i32
    %c0_i32_0 = arith.constant 0 : i32
    return %arg0, %c0_i32, %arg1 : i32, i32, i32
  }
}

</mosaic_0001>

<bundles_post_ra>
// kernel: grid_attention_block_forward.1
= control target key start
LH: loop header
LB: loop body
LE: loop exit
PB: predicated region body
PF: predicated region fallthrough
CT: control target
= control target key end

     0   :  { %s1746_s0 = inlined_call_operand.hbm [shape: f32[2,4,512], index: 0, kind: input, shape index: {}]   ;;  %s1747_s1 = inlined_call_operand.hbm [shape: f32[2,4,512], index: 1, kind: input, shape index: {}]   ;;  %s1748_s2 = inlined_call_operand.hbm [shape: f32[4,4], index: 2, kind: input, shape index: {}]   ;;  %s1749_s3 = inlined_call_operand.hbm [shape: f32[4,1], index: 3, kind: input, shape index: {}]   ;;  %s1750_s4 = inlined_call_operand.hbm [shape: f32[4,4], index: 4, kind: input, shape index: {}]   ;;  %s1751_s5 = inlined_call_operand.hbm [shape: f32[4,1], index: 5, kind: input, shape index: {}]   ;;  %s1752_s6 = inlined_call_operand.hbm [shape: f32[2,4,512], index: 6, kind: output, shape index: {}]  }
   0x1   :  { %1758 = sst [smem:[#allocation21_spill]] %s1748_s2 }
   0x2   :  { %1759 = sst [smem:[#allocation22_spill]] %s1749_s3 }
   0x3   :  { %1760 = sst [smem:[#allocation23_spill]] %s1750_s4 }
   0x4   :  { %1761 = sst [smem:[#allocation24_spill]] %s1751_s5 }
   0x5   :  { %11 = vsyncpa [#allocation3], 0 }
   0x6   :  { %13 = vsyncpa [#allocation3 + $0x1], 0 }
   0x7   :  { %14 = vsyncpa [#allocation6], 0 }
   0x8   :  { %16 = vsyncpa [#allocation6 + $0x1], 0 }
   0x9   :  { %17 = vsyncpa [#allocation9], 0 }
   0xa   :  { %18 = vsyncpa [#allocation12], 0 }
   0xb   :  { %19 = vsyncpa [#allocation4], 0 }
   0xc   :  { %21 = vsyncpa [#allocation4 + $0x1], 0  ;;  %s1399_s21 = smov 0   ;;  %s1401_s22 = smov 0  }
   0xd   :  { %s1403_s23 = smov 0   ;;  %s1405_s24 = smov 0  }
   0xe   :  { %s1407_s25 = smov 0   ;;  %s1409_s26 = smov 0  }
   0xf LB: > { %s1430_s27 = sadd.s32 4294967295, %s1353_s26   ;;  %p910_p0 = scmp.ge.s32.totalorder %s1353_s26, 1  ;;  %s1353_s26 = sphi %s1409_s26, %s27_s26   ;;  %s1349_s25 = sphi %s1407_s25, %s1792_s25   ;;  %s1345_s24 = sphi %s1405_s24, %s1791_s24   ;;  %s1341_s23 = sphi %s1403_s23, %s1790_s23   ;;  %s1337_s22 = sphi %s1401_s22, %s1789_s22   ;;  %s1333_s21 = sphi %s1399_s21, %s1788_s21  }
  0x10   : > { %p1753_p1 = scmp.eq.s32.totalorder %s1430_s27, 0  ;;  %p212_p2 = scmp.lt.s32.totalorder %s1353_s26, 3 }
  0x11   : > { %s1355_s29 = smov [#allocation7]   ;;  %s1356_s7 = smov [#allocation8]  }
  0x12   : > { %p1435_p3 = pnand %p910_p0, %p212_p2  ;;  %s225_s30 = sshll.u32 %s1355_s29, 4  ;;  %s226_s30 = int_to_ptr.vmem [resolvable:$true] %s225_s30 }
  0x13   : > { %s236_s8 = sshll.u32 %s1356_s7, 4  ;;  %s1357_s10 = smov [#allocation10]   ;;  %s1448_s8 = int_to_ptr.vmem [resolvable:$true] %s236_s8 }
  0x14   : > { %s1762_s28 = scalar_select %p1435_p3, 1, 0 }
  0x15   : > { %p976_p5 = pneg %p1435_p3  ;;  %s247_s11 = sshll.u32 %s1357_s10, 4  ;;  %s1450_s11 = int_to_ptr.vmem [resolvable:$true] %s247_s11 }
  0x16   : > { %s1764_s2 = sld [smem:[#allocation21_spill]] }
  0x17   : > { %p1444_p6 = pnand %p976_p5, %p1753_p1 }
  0x19   : > { %p1460_p8 = pneg %p1444_p6 }
  0x1c   : > { %s1083_s14 = scalar_lea.hbm %s1764_s2, 64 }
  0x1d   : > { %p1084_p7 = scmp.ne.s32.totalorder %s1764_s2, %s1083_s14  ;;  %p1090_p11 = scmp.lt.u32.totalorder %s1083_s14, %s1764_s2 }
  0x1f   : > { %p1086_p9 = pnand %p1460_p8, %p1084_p7 }
  0x21   : > { %p1087_p10 = pneg %p1086_p9 }
  0x23   : > { %p1092_p12 = pnand %p1090_p11, %p1087_p10 }
  0x25   : > { %1095 = shalt.err (!%p1092_p12)
}
  0x26   : > { %s1096_s20 = scalar_lea.vmem %s226_s30, 64  ;;  %p1104_p5 = scmp.lt.s32.totalorder %s226_s30, %s226_s30 }
  0x27   : > { %p1097_p13 = scmp.ne.s32.totalorder %s226_s30, %s1096_s20  ;;  %p1105_p4 = scmp.lt.s32.totalorder %s1096_s20, %s1096_s20 }
  0x29   : > { %p1099_p0 = pnand %p1097_p13, %p1460_p8  ;;  %p1106_p1 = por %p1105_p4, %p1104_p5 }
  0x2b   : > { %p1100_p2 = pneg %p1099_p0 }
  0x2d   : > { %p1107_p3 = pnand %p1106_p1, %p1100_p2 }
  0x2f   : > { %1110 = shalt.err (!%p1107_p3)
}
  0x30   : > { %979 = dma.hbm_to_vmem [thread:$0]  (!%p1444_p6), %s1764_s2, 64, %s226_s30, [#allocation6]  }
  0x31   : > { %s1766_s3 = sld [smem:[#allocation22_spill]] }
  0x37   : > { %s1111_s13 = scalar_lea.hbm %s1766_s3, 64 }
  0x38   : > { %p1112_p7 = scmp.ne.s32.totalorder %s1766_s3, %s1111_s13  ;;  %p1118_p1 = scmp.lt.u32.totalorder %s1111_s13, %s1766_s3 }
  0x3a   : > { %p1114_p9 = pnand %p1112_p7, %p1460_p8 }
  0x3c   : > { %p1115_p4 = pneg %p1114_p9 }
  0x3e   : > { %p1120_p3 = pnand %p1118_p1, %p1115_p4 }
  0x40   : > { %1123 = shalt.err (!%p1120_p3)
}
  0x41   : > { %s1124_s30 = scalar_lea.vmem %s1448_s8, 64  ;;  %p1132_p13 = scmp.lt.s32.totalorder %s1448_s8, %s1448_s8 }
  0x42   : > { %p1125_p10 = scmp.ne.s32.totalorder %s1448_s8, %s1124_s30  ;;  %p1133_p0 = scmp.lt.s32.totalorder %s1124_s30, %s1124_s30 }
  0x44   : > { %p1127_p11 = pnand %p1125_p10, %p1460_p8  ;;  %p1134_p2 = por %p1133_p0, %p1132_p13 }
  0x46   : > { %p1128_p12 = pneg %p1127_p11 }
  0x48   : > { %p1135_p5 = pnand %p1134_p2, %p1128_p12 }
  0x4a   : > { %1138 = shalt.err (!%p1135_p5)
}
  0x4b   : > { %982 = dma.hbm_to_vmem [thread:$0]  (!%p1444_p6), %s1766_s3, 64, %s1448_s8, [#allocation9]  }
  0x4c   : > { %s1767_s4 = sld [smem:[#allocation23_spill]] }
  0x52   : > { %s1139_s10 = scalar_lea.hbm %s1767_s4, 64 }
  0x53   : > { %p1140_p7 = scmp.ne.s32.totalorder %s1767_s4, %s1139_s10  ;;  %p1146_p1 = scmp.lt.u32.totalorder %s1139_s10, %s1767_s4 }
  0x55   : > { %p1142_p9 = pnand %p1140_p7, %p1460_p8 }
  0x57   : > { %p1143_p4 = pneg %p1142_p9 }
  0x59   : > { %p1148_p3 = pnand %p1146_p1, %p1143_p4 }
  0x5b   : > { %1151 = shalt.err (!%p1148_p3)
}
  0x5c   : > { %s1152_s8 = scalar_lea.vmem %s1450_s11, 64  ;;  %p1160_p13 = scmp.lt.s32.totalorder %s1450_s11, %s1450_s11 }
  0x5d   : > { %p1153_p10 = scmp.ne.s32.totalorder %s1450_s11, %s1152_s8  ;;  %p1161_p0 = scmp.lt.s32.totalorder %s1152_s8, %s1152_s8 }
  0x5f   : > { %p1155_p11 = pnand %p1153_p10, %p1460_p8  ;;  %p1162_p2 = por %p1161_p0, %p1160_p13 }
  0x61   : > { %p1156_p12 = pneg %p1155_p11 }
  0x63   : > { %p1163_p5 = pnand %p1162_p2, %p1156_p12 }
  0x65   : > { %1166 = shalt.err (!%p1163_p5)
}
  0x66   : > { %985 = dma.hbm_to_vmem [thread:$0]  (!%p1444_p6), %s1767_s4, 64, %s1450_s11, [#allocation9]  }
  0x67   : > { %s1358_s30 = smov [#allocation11]   ;;  %s1768_s5 = sld [smem:[#allocation24_spill]] }
  0x68   : > { %s258_s19 = sshll.u32 %s1358_s30, 4  ;;  %s259_s19 = int_to_ptr.vmem [resolvable:$true] %s258_s19 }
  0x6d   : > { %s1167_s7 = scalar_lea.hbm %s1768_s5, 64 }
  0x6e   : > { %p1168_p7 = scmp.ne.s32.totalorder %s1768_s5, %s1167_s7  ;;  %p1174_p1 = scmp.lt.u32.totalorder %s1167_s7, %s1768_s5 }
  0x70   : > { %p1170_p9 = pnand %p1168_p7, %p1460_p8 }
  0x72   : > { %p1171_p4 = pneg %p1170_p9 }
  0x74   : > { %p1176_p3 = pnand %p1174_p1, %p1171_p4 }
  0x76   : > { %1179 = shalt.err (!%p1176_p3)
}
  0x77   : > { %s1180_s11 = scalar_lea.vmem %s259_s19, 64  ;;  %p1188_p13 = scmp.lt.s32.totalorder %s259_s19, %s259_s19 }
  0x78   : > { %p1181_p10 = scmp.ne.s32.totalorder %s259_s19, %s1180_s11  ;;  %p1189_p0 = scmp.lt.s32.totalorder %s1180_s11, %s1180_s11 }
  0x7a   : > { %p1183_p11 = pnand %p1181_p10, %p1460_p8  ;;  %p1190_p2 = por %p1189_p0, %p1188_p13 }
  0x7c   : > { %p1184_p12 = pneg %p1183_p11 }
  0x7e   : > { %p1191_p5 = pnand %p1190_p2, %p1184_p12 }
  0x80   : > { %1194 = shalt.err (!%p1191_p5)
}
  0x81   : > { %988 = dma.hbm_to_vmem [thread:$0]  (!%p1444_p6), %s1768_s5, 64, %s259_s19, [#allocation12]  }
  0x82   : > { %s909_s17 = sadd.s32 4294967294, %s1353_s26   ;;  %s39_s16 = sadd.s32 1, %s1349_s25 }
  0x83   : > { %p41_p8 = scmp.ge.s32.totalorder %s39_s16, 2  ;;  %s48_s9 = sadd.s32 1, %s1341_s23 }
  0x84   : > { %p55_p7 = scmp.ne.s32.totalorder %s1341_s23, %s1337_s22  ;;  %p56_p9 = scmp.eq.s32.totalorder %s1353_s26, 0 }
  0x85   : > { %s1794_s16 = smov (%p41_p8, %s39_s16), 0  ;;  %p61_p1 = scmp.ne.s32.totalorder %s1337_s22, %s1333_s21 }
  0x86   : > { %1769 = sst [smem:[#allocation20_spill]] %s1794_s16  ;;  %p1548_p4 = por %p56_p9, %p55_p7 }
  0x87   : > { %s43_s30 = ssub.s32 %s1349_s25, %s1794_s16  ;;  %p199_p6 = scmp.eq.s32.totalorder %s1430_s27, 1 }
  0x88   : > { %p46_p3 = scmp.eq.s32.totalorder %s43_s30, 0  ;;  %p1771_p10 = scmp.eq.s32.totalorder %s1430_s27, 0 }
  0x89   : > { %p1563_p12 = por %p199_p6, %p55_p7  ;;  %p205_p13 = scmp.eq.s32.totalorder %s909_s17, 1 }
  0x8a   : > { %p1559_p11 = por %p1771_p10, %p61_p1  ;;  %p1004_p2 = scmp.lt.s32.totalorder %s1353_s26, 2 }
  0x8b   : > { %s1773_s20 = scalar_select %p1563_p12, 1, 0 }
  0x8c   : > { %s1772_s19 = scalar_select %p1559_p11, 1, 0 }
  0x8d   : > { %s1568_s29 = scalar_select %p46_p3, %s1341_s23, %s48_s9  }
  0x8e   : > { %p1570_p0 = por %p205_p13, %p61_p1  ;;  %s269_s10 = sand.u32 1, %s1341_s23  }
  0x8f   : > { %s951_s12 = sshll.u32 %s1349_s25, 8  ;;  %s1577_s13 = sshll.u32 %s269_s10, 4 }
  0x90   : > { %s1774_s7 = scalar_select %p1570_p0, 1, 0 }
  0x91   : > { %s1582_s15 = scalar_lea.hbm %s1746_s0, %s951_s12  ;;  %s273_s8 = scalar_lea.vmem [#allocation2], %s1577_s13 }
  0x92   : > { %s283_s17 = sshll.u32 %s273_s8, 4  ;;  %p1587_p5 = pnand %p1004_p2, %p1548_p4  ;;  %s1591_s17 = int_to_ptr.vmem [resolvable:$true] %s283_s17 }
  0x93   : > { %s1596_s11 = scalar_lea.hbm %s1747_s1, %s951_s12  ;;  %s270_s2 = scalar_lea.sflag [#allocation3], %s269_s10 }
  0x94   : > { %s1195_s3 = scalar_lea.hbm %s1582_s15, 256  ;;  %p1197_p7 = pneg %p1587_p5 }
  0x95   : > { %p1196_p8 = scmp.ne.s32.totalorder %s1582_s15, %s1195_s3  ;;  %s1200_s4 = scalar_lea.hbm %s1746_s0, 512 }
  0x96   : > { %p1201_p1 = scmp.lt.u32.totalorder %s1582_s15, %s1746_s0  ;;  %p1202_p6 = scmp.lt.u32.totalorder %s1200_s4, %s1195_s3 }
  0x97   : > { %p1198_p9 = pnand %p1197_p7, %p1196_p8  ;;  %p1204_p10 = scmp.lt.u32.totalorder %s1195_s3, %s1582_s15 }
  0x98   : > { %p1203_p3 = por %p1202_p6, %p1201_p1 }
  0x99   : > { %p1199_p4 = pneg %p1198_p9 }
  0x9a   : > { %p1205_p13 = por %p1204_p10, %p1203_p3 }
  0x9c   : > { %p1206_p2 = pnand %p1205_p13, %p1199_p4 }
  0x9e   : > { %1209 = shalt.err (!%p1206_p2)
}
  0x9f   : > { %s1210_s10 = scalar_lea.vmem %s1591_s17, 256  ;;  %s1359_s12 = smov [#allocation2]  }
  0xa0   : > { %p1211_p8 = scmp.ne.s32.totalorder %s1591_s17, %s1210_s10  ;;  %s1215_s30 = sshll.u32 %s1359_s12, 4  ;;  %s1216_s30 = int_to_ptr.vmem [resolvable:$false] %s1215_s30 }
  0xa1   : > { %s1217_s5 = scalar_lea.vmem %s1216_s30, 512  ;;  %p1218_p12 = scmp.lt.s32.totalorder %s1591_s17, %s1216_s30 }
  0xa2   : > { %p1213_p9 = pnand %p1211_p8, %p1197_p7  ;;  %p1219_p1 = scmp.lt.s32.totalorder %s1217_s5, %s1210_s10 }
  0xa4   : > { %p1214_p0 = pneg %p1213_p9  ;;  %p1220_p6 = por %p1219_p1, %p1218_p12 }
  0xa6   : > { %p1221_p3 = pnand %p1220_p6, %p1214_p0 }
  0xa8   : > { %1224 = shalt.err (!%p1221_p3)
}
  0xa9   : > { %992 = dma.hbm_to_vmem [thread:$0]  (!%p1587_p5), %s1582_s15, 256, %s1591_s17, %s270_s2  }
  0xaa   : > { %s290_s3 = sand.u32 1, %s1353_s26   ;;  %s294_s4 = scalar_lea.vmem [#allocation5], %s1577_s13 }
  0xab   : > { %s304_s16 = sshll.u32 %s294_s4, 4  ;;  %s291_s14 = scalar_lea.sflag [#allocation6], %s290_s3  ;;  %s305_s16 = int_to_ptr.vmem [resolvable:$true] %s304_s16 }
  0xac   : > { %s1225_s18 = scalar_lea.hbm %s1596_s11, 256  ;;  %s1230_s12 = scalar_lea.hbm %s1747_s1, 512 }
  0xad   : > { %p1226_p12 = scmp.ne.s32.totalorder %s1596_s11, %s1225_s18  ;;  %p1231_p10 = scmp.lt.u32.totalorder %s1596_s11, %s1747_s1 }
  0xae   : > { %p1232_p13 = scmp.lt.u32.totalorder %s1230_s12, %s1225_s18  ;;  %p1234_p8 = scmp.lt.u32.totalorder %s1225_s18, %s1596_s11 }
  0xaf   : > { %p1228_p0 = pnand %p1226_p12, %p1197_p7 }
  0xb0   : > { %p1233_p2 = por %p1232_p13, %p1231_p10 }
  0xb1   : > { %p1229_p4 = pneg %p1228_p0 }
  0xb2   : > { %p1235_p9 = por %p1234_p8, %p1233_p2 }
  0xb4   : > { %p1236_p1 = pnand %p1235_p9, %p1229_p4 }
  0xb6   : > { %1239 = shalt.err (!%p1236_p1)
}
  0xb7   : > { %s1240_s2 = scalar_lea.vmem %s305_s16, 256  ;;  %s1360_s13 = smov [#allocation5]  }
  0xb8   : > { %p1241_p6 = scmp.ne.s32.totalorder %s305_s16, %s1240_s2  ;;  %s1245_s15 = sshll.u32 %s1360_s13, 4  ;;  %s1246_s15 = int_to_ptr.vmem [resolvable:$false] %s1245_s15 }
  0xb9   : > { %s1247_s17 = scalar_lea.vmem %s1246_s15, 512  ;;  %p1248_p0 = scmp.lt.s32.totalorder %s305_s16, %s1246_s15 }
  0xba   : > { %p1243_p3 = pnand %p1241_p6, %p1197_p7  ;;  %p1249_p11 = scmp.lt.s32.totalorder %s1247_s17, %s1240_s2 }
  0xbc   : > { %p1244_p12 = pneg %p1243_p3  ;;  %p1250_p10 = por %p1249_p11, %p1248_p0 }
  0xbe   : > { %p1251_p13 = pnand %p1250_p10, %p1244_p12 }
  0xc0   : > { %1254 = shalt.err (!%p1251_p13)
}
  0xc1   : > { %995 = dma.hbm_to_vmem [thread:$0]  (!%p1587_p5), %s1596_s11, 256, %s305_s16, %s291_s14  }
  0xc2   : > { %p1776_p4 = scmp.ne.s32.totalorder %s1762_s28, 0 }
  0xc3   : > { %s1647_s3 = sand.u32 (!%p1776_p4), 1, %s1337_s22   ;;  %p1777_p11 = scmp.ne.s32.totalorder (!%p1776_p4), %s1772_s19, 0 }
  0xc4   : > { %313 = sbr.rel (%p1776_p4) target bundleno = 484 (0x1e4), region = 44  ;;  %s1650_s4 = sshll.u32 (!%p1776_p4), %s1647_s3, 4 }
  0xc5   : > { %s316_s18 = scalar_lea.sflag (!%p1776_p4), [#allocation3], %s1647_s3  ;;  %s319_s8 = scalar_lea.vmem (!%p1776_p4), [#allocation2], %s1650_s4 }
  0xcb   : > { %1308 = dma.done.wait (%p1777_p11), %s316_s18, 256  }
  0xcc   : > { %1310 = vsyncadd (%p1777_p11), %s316_s18, 4294967040  ;;  %s324_s28 = sand.u32 1, %s1430_s27   ;;  %s328_s11 = scalar_lea.vmem [#allocation5], %s1650_s4 }
  0xcd   : > { %s325_s9 = scalar_lea.sflag [#allocation6], %s324_s28 }
  0xce   : > { %1312 = dma.done.wait (%p1777_p11), %s325_s9, 256  }
  0xcf   : > { %1314 = vsyncadd (%p1777_p11), %s325_s9, 4294967040  ;;  %p1778_p5 = scmp.eq.s32.totalorder %s1430_s27, 0 }
  0xd1   : > { %1316 = dma.done.wait (%p1778_p5), [#allocation6], 64   ;;  %p1779_p7 = pmov %p1778_p5 }
  0xd2   : > { %p1780_p2 = pmov %p1778_p5 }
  0xd3   : > { %1318 = vsyncadd (%p1779_p7), [#allocation6], 4294967232 }
  0xd4   : > { %1320 = dma.done.wait (%p1780_p2), [#allocation9], 128   ;;  %p1781_p8 = pmov %p1780_p2 }
  0xd5   : > { %p1782_p9 = pmov %p1780_p2 }
  0xd6   : > { %1322 = vsyncadd (%p1781_p8), [#allocation9], 4294967168 }
  0xd7   : > { %1324 = dma.done.wait (%p1782_p9), [#allocation12], 64   ;;  %p1783_p1 = pmov %p1780_p2 }
  0xd8   : > { %v1361_v0 = vmov 0.0   ;;  %v1362_v1 = vmov 0   ;;  %v381_v2 = vld [vmem:[%s328_s11] sm:$0xff]  ;;  %vm398_vm0 = vcmask 1043456   ;;  %v382_v3 = vld [vmem:[%s328_s11 + $0x8] sm:$0xff]  ;;  %vm394_vm1 = vcmask 31744  }
  0xd9   : > { %1326 = vsyncadd (%p1783_p1), [#allocation12], 4294967232  ;;  %471 = vmatprep.mubr.f32.mxu0 %v1361_v0  ;;  %542 = vmatprep.mubr.f32.mxu1 %v1361_v0  ;;  %v392_v4 = vcombine.high %v381_v2, %v381_v2  ;;  %v393_v5 = vcombine.high %v382_v3, %v382_v3  ;;  %v384_v6 = vld [vmem:[#allocation8] sm:$0xf]  ;;  %v383_v7 = vld [vmem:[#allocation7] sm:$0xf] }
  0xda   : > { %1064 = vset.pattern.permute.xlu0 %v1362_v1  ;;  %v549_v8 = vld [vmem:[#allocation10] sm:$0xf]  ;;  %v550_v9 = vld [vmem:[#allocation11] sm:$0xf]  ;;  %v725_v47 = vld [vmem:[%s319_s8] sm:$0xff]  ;;  %s953_s27 = sshll.u32 %s1345_s24, 8 }
  0xdb   : > { %387 = vperm.xlu0 %1064, %v384_v6   ;;  %930 = vmatprep.subr.msk.mxu0 %vm398_vm0, %v392_v4  ;;  %v726_v50 = vld [vmem:[%s319_s8 + $0x8] sm:$0xff]  ;;  %s377_s19 = scalar_lea.vmem [#allocation13], %s1650_s4  ;;  %s1697_s12 = scalar_lea.hbm %s1752_s6, %s953_s27 }
  0xdc   : > { %933 = vmatprep.subr.msk.mxu1 %vm398_vm0, %v393_v5  ;;  %931 = vmatpush1.msk.msra.mxu0 %vm398_vm0, %v381_v2  ;;  %s760_s16 = sshll.u32 %s377_s19, 4  ;;  %s744_s30 = scalar_lea.sflag [#allocation4], %s1647_s3  ;;  %s1699_s16 = int_to_ptr.vmem [resolvable:$true] %s760_s16 }
  0xdd   : > { %934 = vmatpush1.msk.msra.mxu1 %vm398_vm0, %v382_v3  ;;  %932 = vmatmul.mubr.msk.f32.vlgmr.msra.gmra.mrb[0].mxu0 %vm394_vm1, %v383_v7  ;;  %s1255_s5 = scalar_lea.vmem %s1699_s16, 256  ;;  %p1784_p3 = scmp.ne.s32.totalorder %s1773_s20, 0 }
  0xde   : > { %935 = vmatmul.mubr.msk.f32.vlgmr.msra.gmra.mrb[0].mxu1 %vm394_vm1, %v383_v7  ;;  %936 = vmatprep.subr.msk.mxu0 %vm398_vm0, %v392_v4  ;;  %p1256_p6 = scmp.ne.s32.totalorder %s1699_s16, %s1255_s5  ;;  %s1363_s24 = smov [#allocation13]  }
  0xdf   : > { %939 = vmatprep.subr.msk.mxu1 %vm398_vm0, %v393_v5  ;;  %937 = vmatpush1.msk.msra.mxu0 %vm398_vm0, %v381_v2  ;;  %s1259_s2 = sshll.u32 %s1363_s24, 4  ;;  %s1260_s2 = int_to_ptr.vmem [resolvable:$false] %s1259_s2 }
  0xe0   : > { %623 = vmatprep.mubr.f32.mxu0 %v1361_v0  ;;  %940 = vmatpush1.msk.msra.mxu1 %vm398_vm0, %v382_v3  ;;  %p1257_p12 = pnand %p1256_p6, %p1784_p3  ;;  %s1261_s13 = scalar_lea.vmem %s1260_s2, 512 }
  0xe1   : > { %694 = vmatprep.mubr.f32.mxu1 %v1361_v0  ;;  %938 = vmatmul.mubr.msk.f32.vlgmr.msra.gmra.mrb[2].mxu0 %vm394_vm1, %v549_v8  ;;  %p1262_p10 = scmp.lt.s32.totalorder %s1699_s16, %s1260_s2  ;;  %p1263_p13 = scmp.lt.s32.totalorder %s1261_s13, %s1255_s5 }
  0xe2   : > { %941 = vmatmul.mubr.msk.f32.vlgmr.msra.gmra.mrb[2].mxu1 %vm394_vm1, %v549_v8  ;;  %553 = vperm.xlu0 %1064, %v550_v9   ;;  %p1258_p0 = pneg %p1257_p12 }
  0xe3   : > { %p1264_p4 = por %p1263_p13, %p1262_p10 }
  0xe5   : > { %p1265_p11 = pnand %p1264_p4, %p1258_p0 }
 0x15a   : > { %v388_v10 = vpop.permute.xlu0 %387 }
 0x161   : > { %v554_v35 = vpop.permute.xlu0 %553 }
 0x1b0   : > { %v473_v11 = vpop.f32.mrb[0].mxu0 }
 0x1b1   : > { %v544_v12 = vpop.f32.mrb[0].mxu1  ;;  %v474_v13 = vadd.f32 %v473_v11, %v388_v10  ;;  %v475_v15 = vpop.f32.mrb[1].mxu0 }
 0x1b2   : > { %v545_v14 = vadd.f32 %v544_v12, %v388_v10  ;;  %v546_v16 = vpop.f32.mrb[1].mxu1  ;;  %v476_v17 = vadd.f32 %v475_v15, %v388_v10 }
 0x1b3   : > { %v547_v18 = vadd.f32 %v546_v16, %v388_v10  ;;  %v942_v19 = vmul.f32 -1.442695, %v474_v13 }
 0x1b4   : > { %v944_v20 = vmul.f32 -1.442695, %v545_v14  ;;  %v943_v21 = vmul.f32 -1.442695, %v476_v17  ;;  %v625_v23 = vpop.f32.mrb[2].mxu0 }
 0x1b5   : > { %v945_v22 = vmul.f32 -1.442695, %v547_v18  ;;  %v696_v24 = vpop.f32.mrb[2].mxu1  ;;  %1067 = vpow2.f32 %v942_v19  ;;  %v627_v25 = vpop.f32.mrb[3].mxu0  ;;  %v626_v36 = vadd.f32 %v625_v23, %v554_v35 }
 0x1b6   : > { %v698_v26 = vpop.f32.mrb[3].mxu1  ;;  %1069 = vpow2.f32 %v944_v20  ;;  %v697_v38 = vadd.f32 %v696_v24, %v554_v35  ;;  %v628_v41 = vadd.f32 %v627_v25, %v554_v35 }
 0x1b7   : > { %1071 = vpow2.f32 %v943_v21  ;;  %v699_v44 = vadd.f32 %v698_v26, %v554_v35 }
 0x1b8   : > { %1073 = vpow2.f32 %v945_v22 }
 0x1bf   : > { %v1068_v27 = vpop.eup %1067 }
 0x1c0   : > { %v1070_v28 = vpop.eup %1069  ;;  %v713_v29 = vadd.f32 1.0, %v1068_v27 }
 0x1c1   : > { %v1072_v30 = vpop.eup %1071  ;;  %v715_v31 = vadd.f32 1.0, %v1070_v28 }
 0x1c2   : > { %v1074_v32 = vpop.eup %1073  ;;  %1075 = vrcp.f32 %v713_v29  ;;  %v714_v33 = vadd.f32 1.0, %v1072_v30 }
 0x1c3   : > { %1077 = vrcp.f32 %v715_v31  ;;  %v716_v34 = vadd.f32 1.0, %v1074_v32 }
 0x1c4   : > { %1079 = vrcp.f32 %v714_v33 }
 0x1c5   : > { %1081 = vrcp.f32 %v716_v34 }
 0x1cc   : > { %v1076_v37 = vpop.eup %1075 }
 0x1cd   : > { %v1078_v39 = vpop.eup %1077  ;;  %v727_v40 = vmul.f32 %v1076_v37, %v626_v36 }
 0x1ce   : > { %v1080_v42 = vpop.eup %1079  ;;  %v729_v43 = vmul.f32 %v1078_v39, %v697_v38 }
 0x1cf   : > { %v1082_v45 = vpop.eup %1081  ;;  %v728_v46 = vmul.f32 %v1080_v42, %v628_v41 }
 0x1d0   : > { %v730_v48 = vmul.f32 %v1082_v45, %v699_v44 }
 0x1d1   : > { %v735_v49 = vcombine.low %v727_v40, %v728_v46 }
 0x1d2   : > { %v736_v51 = vcombine.low %v729_v43, %v730_v48 }
 0x1d3   : > { %v739_v52 = vadd.f32 %v735_v49, %v725_v47 }
 0x1d4   : > { %v740_v53 = vadd.f32 %v736_v51, %v726_v50 }
 0x1d5   : > { %741 = vst [vmem:[%s377_s19] sm:$0xff] %v739_v52 }
 0x1d6   : > { %742 = vst [vmem:[%s377_s19 + $0x8] sm:$0xff] %v740_v53 }
 0x1d7   : > { %1268 = shalt.err (!%p1265_p11)
}
 0x1d8   : > { %s1269_s15 = scalar_lea.hbm %s1697_s12, 256  ;;  %s1273_s4 = scalar_lea.hbm %s1752_s6, 512 }
 0x1d9   : > { %p1270_p5 = scmp.ne.s32.totalorder %s1697_s12, %s1269_s15  ;;  %p1274_p8 = scmp.lt.u32.totalorder %s1697_s12, %s1752_s6 }
 0x1da   : > { %p1275_p9 = scmp.lt.u32.totalorder %s1273_s4, %s1269_s15  ;;  %p1277_p6 = scmp.lt.u32.totalorder %s1269_s15, %s1697_s12 }
 0x1db   : > { %p1271_p7 = pnand %p1270_p5, %p1784_p3 }
 0x1dc   : > { %p1276_p1 = por %p1275_p9, %p1274_p8 }
 0x1dd   : > { %p1272_p2 = pneg %p1271_p7 }
 0x1de   : > { %p1278_p12 = por %p1277_p6, %p1276_p1 }
 0x1e0   : > { %p1279_p0 = pnand %p1278_p12, %p1272_p2 }
 0x1e2   : > { %1282 = shalt.err (!%p1279_p0)
}
 0x1e3   : > { %974 = dma.vmem_to_hbm [thread:$0]  (%p1784_p3), %s1699_s16, 256, %s1697_s12, %s744_s30  }
 0x1e4 PF: > { %s772_s28 = sand.u32 1, %s1333_s21   ;;  %p1785_p10 = scmp.ne.s32.totalorder %s1774_s7, 0 }
 0x1e5   : > { %p1786_p13 = scmp.ge.s32.totalorder %s1353_s26, 2  ;;  %s773_s9 = scalar_lea.sflag [#allocation4], %s772_s28 }
 0x1e7   : > { %p997_p4 = pnand %p1786_p13, %p1785_p10 }
 0x1e9   : > { %1328 = dma.done.wait (!%p997_p4), %s773_s9, 256  }
 0x1ea   : > { %1330 = vsyncadd (!%p997_p4), %s773_s9, 4294967040  ;;  %s27_s26 = sadd.s32 1, %s1353_s26   ;;  %s1787_s20 = sld [smem:[#allocation20_spill]] }
 0x1eb   : > { %p24_p11 = scmp.ge.s32.totalorder %s27_s26, 4   ;;  %s1788_s21 = smov %s1337_s22 }
 0x1ec   : > { %s1789_s22 = smov %s1341_s23  ;;  %s1790_s23 = smov %s1568_s29 }
 0x1ed   : > { %s1791_s24 = smov %s1349_s25  ;;  %26 = sbr.rel (!%p24_p11) target bundleno = 15 (0xf), region = 118 }
 0x1f0   : > { %s1792_s25 = smov %s1787_s20 }
 0x1f4   :  { %778 = vsyncpa [#allocation3], 1 }
 0x1f5   :  { %780 = vsyncpa [#allocation3 + $0x1], 1 }
 0x1f6   :  { %781 = vsyncpa [#allocation6], 1 }
 0x1f7   :  { %783 = vsyncpa [#allocation6 + $0x1], 1 }
 0x1f8   :  { %784 = vsyncpa [#allocation9], 1 }
 0x1f9   :  { %785 = vsyncpa [#allocation12], 1 }
 0x1fa   :  { %786 = vsyncpa [#allocation4], 1 }
 0x1fb   :  { %788 = vsyncpa [#allocation4 + $0x1], 1 }

</bundles_post_ra>
